<compile_context>
chip_gen: v7x
topology: tpu7x:2x2x1
jax: 0.10.0
libtpu: 0.0.40
codegen_flags: <defaults>
</compile_context>

<pallas_src>
import functools

import jax
import jax.numpy as jnp
from jax.experimental import pallas as pl
from jax.experimental.pallas import tpu as pltpu

_LANE = 128     # lane width: hidden-dim padding target (VMEM-resident only)
_SUBLANE = 8    # f32 sublane; tm must be a multiple of this


def _round_up(x, m):
    return (x + m - 1) // m * m


def _sigmoid_f32(x):
    # sigmoid(x) == 0.5 * tanh(0.5 * x) + 0.5  -> one EUP op, no VALU divide.
    return 0.5 * jnp.tanh(0.5 * x) + 0.5


def mlp_kernel(x_ref, w1_ref, b1_ref, w2_ref, b2_ref, out_ref):
    # Cast x to bf16 in-kernel (no separate XLA pad/cast pass over HBM).
    x_bf16 = x_ref[...].astype(w1_ref.dtype)

    # Layer 1: bf16 operands, f32 accumulation on the MXU; f32 bias + sigmoid.
    l1 = jnp.dot(x_bf16, w1_ref[...], preferred_element_type=jnp.float32)
    a1 = _sigmoid_f32(l1 + b1_ref[...])

    # Layer 2: padded hidden rows of W2 are zero, so padded-lane activations
    # (sigmoid(0)=0.5) contribute exactly nothing.
    l2 = jnp.dot(a1.astype(w2_ref.dtype), w2_ref[...],
                 preferred_element_type=jnp.float32)
    out_ref[...] = _sigmoid_f32(l2 + b2_ref[...]).astype(out_ref.dtype)


def prepare_params(w1, b1, w2, b2, param_dtype=jnp.bfloat16):
    """One-time: transpose weights to (in, out); pad only the hidden dim to 128.

    w1: (H, D_in), b1: (H,), w2: (D_out, H), b2: (D_out,)  (PyTorch layout).
    """
    H, D_in = w1.shape
    D_out = w2.shape[0]
    h_p = _round_up(H, _LANE)

    w1_p = jnp.zeros((D_in, h_p), param_dtype).at[:, :H].set(
        jnp.transpose(w1).astype(param_dtype))
    w2_p = jnp.zeros((h_p, D_out), param_dtype).at[:H, :].set(
        jnp.transpose(w2).astype(param_dtype))
    b1_p = jnp.zeros((1, h_p), jnp.float32).at[0, :H].set(b1.astype(jnp.float32))
    b2_p = b2.astype(jnp.float32).reshape(1, D_out)
    return (w1_p, b1_p, w2_p, b2_p)


@functools.partial(jax.jit, static_argnames=("tm",))
def _forward(x_p, w1_p, b1_p, w2_p, b2_p, *, tm):
    n_p, d_in = x_p.shape
    h_p = w1_p.shape[1]
    d_out = w2_p.shape[1]
    grid = (n_p // tm,)

    # Advisory cost estimate (actual unpadded-ish traffic; padded H is VMEM-only).
    flops = 2 * n_p * (d_in * h_p + h_p * d_out)
    transcendentals = n_p * (h_p + d_out)
    bytes_accessed = (n_p * d_in * x_p.dtype.itemsize        # x read
                      + (w1_p.size + w2_p.size) * 2          # bf16 weights
                      + (b1_p.size + b2_p.size) * 4          # f32 biases
                      + n_p * d_out * 4)                     # f32 output write

    return pl.pallas_call(
        mlp_kernel,
        out_shape=jax.ShapeDtypeStruct((n_p, d_out), jnp.float32),
        grid=grid,
        in_specs=[
            pl.BlockSpec((tm, d_in), lambda i: (i, 0)),      # x tile (pipelined)
            pl.BlockSpec((d_in, h_p), lambda i: (0, 0)),     # W1 resident
            pl.BlockSpec((1, h_p), lambda i: (0, 0)),        # b1 resident
            pl.BlockSpec((h_p, d_out), lambda i: (0, 0)),    # W2 resident
            pl.BlockSpec((1, d_out), lambda i: (0, 0)),      # b2 resident
        ],
        out_specs=pl.BlockSpec((tm, d_out), lambda i: (i, 0)),  # (tm, D_out) tile
        compiler_params=pltpu.CompilerParams(
            dimension_semantics=("parallel",),                  # 2 TCs on v7x
            vmem_limit_bytes=32 * 1024 * 1024),
        cost_estimate=pl.CostEstimate(
            flops=flops, transcendentals=transcendentals,
            bytes_accessed=bytes_accessed),
    )(x_p, w1_p, b1_p, w2_p, b2_p)


def net_forward(x, params, tm_cap=512):
    """x: (N, D_in); params from prepare_params. Returns (N, D_out) f32."""
    w1_p, b1_p, w2_p, b2_p = params
    n = x.shape[0]

    n8 = _round_up(max(n, _SUBLANE), _SUBLANE)
    if n8 <= tm_cap:
        tm = n8                 # tiny N: single grid step, no pipeline overhead
    else:
        tm = tm_cap             # large N: 512 rows fills the 256-wide MXU
    n_p = _round_up(n8, tm)

    if n_p != n:                # batch pad only when actually needed
        x = jnp.pad(x, ((0, n_p - n), (0, 0)))

    out = _forward(x, w1_p, b1_p, w2_p, b2_p, tm=tm)
    return out[:n] if n_p != n else out


def reference_forward_f32(x, w1, b1, w2, b2):
    a1 = jax.nn.sigmoid(x @ w1.T + b1)
    return jax.nn.sigmoid(a1 @ w2.T + b2)


def reference_forward_matched(x, w1, b1, w2, b2):
    # Same precision recipe as the kernel: bf16 dot operands, f32 accumulate,
    # f32 bias/activation.
    l1 = jnp.dot(x.astype(jnp.bfloat16), w1.astype(jnp.bfloat16).T,
                 preferred_element_type=jnp.float32) + b1
    a1 = jax.nn.sigmoid(l1)
    l2 = jnp.dot(a1.astype(jnp.bfloat16), w2.astype(jnp.bfloat16).T,
                 preferred_element_type=jnp.float32) + b2
    return jax.nn.sigmoid(l2)


if __name__ == "__main__":
    # Shapes implied by Net(D_in, H, D_out).
    N, D_in, H, D_out = 256, 16, 32, 4

    key = jax.random.PRNGKey(0)
    kx, kw1, kb1, kw2, kb2 = jax.random.split(key, 5)

    x = jax.random.normal(kx, (N, D_in), dtype=jnp.float32)

    # PyTorch-style uniform(-1/sqrt(fan_in), 1/sqrt(fan_in)) init.
    bound1 = 1.0 / jnp.sqrt(D_in)
    w1 = jax.random.uniform(kw1, (H, D_in), jnp.float32, -bound1, bound1)
    b1 = jax.random.uniform(kb1, (H,), jnp.float32, -bound1, bound1)
    bound2 = 1.0 / jnp.sqrt(H)
    w2 = jax.random.uniform(kw2, (D_out, H), jnp.float32, -bound2, bound2)
    b2 = jax.random.uniform(kb2, (D_out,), jnp.float32, -bound2, bound2)

    params = prepare_params(w1, b1, w2, b2)   # one-time transpose/pad/cast
    yhat = net_forward(x, params)
    yhat = jax.block_until_ready(yhat)

    assert yhat.shape == (N, D_out)

    # Tight check vs. a reference using the same bf16-operand / f32-accumulate recipe.
    ref_matched = reference_forward_matched(x, w1, b1, w2, b2)
    assert jnp.allclose(yhat, ref_matched, atol=1e-4, rtol=1e-4)

    # Loose check vs. the pure-f32 PyTorch-semantics reference (bf16 rounding only).
    ref_f32 = reference_forward_f32(x, w1, b1, w2, b2)
    assert jnp.allclose(yhat, ref_f32, atol=2e-2, rtol=2e-2)

    print("KERNEL_OK")
</pallas_src>

<mosaic_0001>
module attributes {stable_mosaic.version = 11 : i64} {
  func.func @mlp_kernel(%arg0: i32, %arg1: memref<256x16xf32, #tpu.memory_space<vmem>>, %arg2: memref<16x128xbf16, #tpu.memory_space<vmem>>, %arg3: memref<1x128xf32, #tpu.memory_space<vmem>>, %arg4: memref<128x4xbf16, #tpu.memory_space<vmem>>, %arg5: memref<1x4xf32, #tpu.memory_space<vmem>>, %arg6: memref<256x4xf32, #tpu.memory_space<vmem>>) attributes {dimension_semantics = [#tpu.dimension_semantics<parallel>], iteration_bounds = array<i64: 1>, scalar_prefetch = 0 : i64, scratch_operands = 0 : i64, tpu.core_type = #tpu.core_type<tc>, window_params = [{transform_indices = @transform_0, window_bounds = array<i64: 256, 16>}, {pipeline_mode = #tpu.pipeline_mode<synchronous>, transform_indices = @transform_1, window_bounds = array<i64: 16, 128>}, {pipeline_mode = #tpu.pipeline_mode<synchronous>, transform_indices = @transform_2, window_bounds = array<i64: 1, 128>}, {pipeline_mode = #tpu.pipeline_mode<synchronous>, transform_indices = @transform_3, window_bounds = array<i64: 128, 4>}, {pipeline_mode = #tpu.pipeline_mode<synchronous>, transform_indices = @transform_4, window_bounds = array<i64: 1, 4>}, {transform_indices = @transform_5, window_bounds = array<i64: 256, 4>}]} {
    %c0 = arith.constant 0 : index
    %c0_0 = arith.constant 0 : index
    %0 = vector.load %arg1[%c0, %c0_0] : memref<256x16xf32, #tpu.memory_space<vmem>>, vector<256x16xf32>
    %1 = arith.truncf %0 : vector<256x16xf32> to vector<256x16xbf16>
    %c0_1 = arith.constant 0 : index
    %c0_2 = arith.constant 0 : index
    %2 = vector.load %arg2[%c0_1, %c0_2] : memref<16x128xbf16, #tpu.memory_space<vmem>>, vector<16x128xbf16>
    %cst = arith.constant dense<0.000000e+00> : vector<256x128xf32>
    %3 = tpu.matmul %1, %2, %cst {dimension_numbers = #tpu.dot_dimension_numbers<[1], [0], [0], [1], [0, 0, 1, 1], [], []>} : vector<256x16xbf16>, vector<16x128xbf16>, vector<256x128xf32> -> vector<256x128xf32>
    %c0_3 = arith.constant 0 : index
    %c0_4 = arith.constant 0 : index
    %4 = vector.load %arg3[%c0_3, %c0_4] : memref<1x128xf32, #tpu.memory_space<vmem>>, vector<1x128xf32>
    %5 = vector.broadcast %4 : vector<1x128xf32> to vector<256x128xf32>
    %6 = arith.addf %3, %5 : vector<256x128xf32>
    %cst_5 = arith.constant 5.000000e-01 : f32
    %7 = vector.broadcast %cst_5 : f32 to vector<256x128xf32>
    %8 = arith.mulf %7, %6 : vector<256x128xf32>
    %9 = math.tanh %8 : vector<256x128xf32>
    %cst_6 = arith.constant 5.000000e-01 : f32
    %10 = vector.broadcast %cst_6 : f32 to vector<256x128xf32>
    %11 = arith.mulf %10, %9 : vector<256x128xf32>
    %cst_7 = arith.constant 5.000000e-01 : f32
    %12 = vector.broadcast %cst_7 : f32 to vector<256x128xf32>
    %13 = arith.addf %11, %12 : vector<256x128xf32>
    %14 = arith.truncf %13 : vector<256x128xf32> to vector<256x128xbf16>
    %c0_8 = arith.constant 0 : index
    %c0_9 = arith.constant 0 : index
    %15 = vector.load %arg4[%c0_8, %c0_9] : memref<128x4xbf16, #tpu.memory_space<vmem>>, vector<128x4xbf16>
    %cst_10 = arith.constant dense<0.000000e+00> : vector<256x4xf32>
    %16 = tpu.matmul %14, %15, %cst_10 {dimension_numbers = #tpu.dot_dimension_numbers<[1], [0], [0], [1], [0, 0, 1, 1], [], []>} : vector<256x128xbf16>, vector<128x4xbf16>, vector<256x4xf32> -> vector<256x4xf32>
    %c0_11 = arith.constant 0 : index
    %c0_12 = arith.constant 0 : index
    %17 = vector.load %arg5[%c0_11, %c0_12] : memref<1x4xf32, #tpu.memory_space<vmem>>, vector<1x4xf32>
    %18 = vector.broadcast %17 : vector<1x4xf32> to vector<256x4xf32>
    %19 = arith.addf %16, %18 : vector<256x4xf32>
    %cst_13 = arith.constant 5.000000e-01 : f32
    %20 = vector.broadcast %cst_13 : f32 to vector<256x4xf32>
    %21 = arith.mulf %20, %19 : vector<256x4xf32>
    %22 = math.tanh %21 : vector<256x4xf32>
    %cst_14 = arith.constant 5.000000e-01 : f32
    %23 = vector.broadcast %cst_14 : f32 to vector<256x4xf32>
    %24 = arith.mulf %23, %22 : vector<256x4xf32>
    %cst_15 = arith.constant 5.000000e-01 : f32
    %25 = vector.broadcast %cst_15 : f32 to vector<256x4xf32>
    %26 = arith.addf %24, %25 : vector<256x4xf32>
    %c0_16 = arith.constant 0 : index
    %c0_17 = arith.constant 0 : index
    %27 = vector.load %arg6[%c0_16, %c0_17] : memref<256x4xf32, #tpu.memory_space<vmem>>, vector<256x4xf32>
    tpu.vector_store %arg6[%c0_16, %c0_17], %26 {strides = array<i32>} : memref<256x4xf32, #tpu.memory_space<vmem>>, vector<256x4xf32>,
    return
  }
  func.func @transform_0(%arg0: i32) -> (i32, i32) {
    %c0_i32 = arith.constant 0 : i32
    %c0_i32_0 = arith.constant 0 : i32
    return %arg0, %c0_i32 : i32, i32
  }
  func.func @transform_1(%arg0: i32) -> (i32, i32) {
    %c0_i32 = arith.constant 0 : i32
    %c0_i32_0 = arith.constant 0 : i32
    %c0_i32_1 = arith.constant 0 : i32
    return %c0_i32, %c0_i32_0 : i32, i32
  }
  func.func @transform_2(%arg0: i32) -> (i32, i32) {
    %c0_i32 = arith.constant 0 : i32
    %c0_i32_0 = arith.constant 0 : i32
    %c0_i32_1 = arith.constant 0 : i32
    return %c0_i32, %c0_i32_0 : i32, i32
  }
  func.func @transform_3(%arg0: i32) -> (i32, i32) {
    %c0_i32 = arith.constant 0 : i32
    %c0_i32_0 = arith.constant 0 : i32
    %c0_i32_1 = arith.constant 0 : i32
    return %c0_i32, %c0_i32_0 : i32, i32
  }
  func.func @transform_4(%arg0: i32) -> (i32, i32) {
    %c0_i32 = arith.constant 0 : i32
    %c0_i32_0 = arith.constant 0 : i32
    %c0_i32_1 = arith.constant 0 : i32
    return %c0_i32, %c0_i32_0 : i32, i32
  }
  func.func @transform_5(%arg0: i32) -> (i32, i32) {
    %c0_i32 = arith.constant 0 : i32
    %c0_i32_0 = arith.constant 0 : i32
    return %arg0, %c0_i32 : i32, i32
  }
}

</mosaic_0001>

<bundles_post_ra>
// kernel: _forward.1
= control target key start
LH: loop header
LB: loop body
LE: loop exit
PB: predicated region body
PF: predicated region fallthrough
CT: control target
= control target key end

     0   :  { %vm84_vm0 = vcmask 130048   ;;  %vm798_vm1 = vcmask 31744   ;;  %s1509_s1 = inlined_call_operand.vmem [shape: bf16[16,128], index: 1, kind: input, shape index: {}]   ;;  %s1510_s0 = inlined_call_operand.vmem [shape: f32[256,16], index: 0, kind: input, shape index: {}]   ;;  %s1511_s3 = inlined_call_operand.vmem [shape: bf16[128,4], index: 3, kind: input, shape index: {}]   ;;  %s1512_s2 = inlined_call_operand.vmem [shape: f32[1,128], index: 2, kind: input, shape index: {}]   ;;  %s1513_s4 = inlined_call_operand.vmem [shape: f32[1,4], index: 4, kind: input, shape index: {}]   ;;  %s1514_s5 = inlined_call_operand.vmem [shape: f32[256,4], index: 5, kind: output, shape index: {}]  }
   0x1   :  { %v1001_v0 = vld [vmem:[%s1509_s1] sm:$0xff]   ;;  %v22_v2 = vld [vmem:[%s1510_s0 + $0x8] sm:$0xff]  ;;  %v23_v3 = vld [vmem:[%s1510_s0 + $0x10] sm:$0xff] }
   0x2   :  { %v21_v1 = vld [vmem:[%s1510_s0] sm:$0xff]  ;;  %903 = vmatprep.subr.bf16.mxu0 %v1001_v0  ;;  %v24_v5 = vld [vmem:[%s1510_s0 + $0x18] sm:$0xff]  ;;  %v26_v7 = vld [vmem:[%s1510_s0 + $0x28] sm:$0xff] }
   0x3   :  { %v53_v4 = vpack.c.bf16 %v22_v2, %v21_v1  ;;  %v25_v6 = vld [vmem:[%s1510_s0 + $0x20] sm:$0xff]  ;;  %904 = vmatpush3.bf16.msra.mxu0 %v1001_v0  ;;  %v54_v8 = vpack.c.bf16 %v24_v5, %v23_v3  ;;  %v27_v10 = vld [vmem:[%s1510_s0 + $0x30] sm:$0xff]  ;;  %v28_v11 = vld [vmem:[%s1510_s0 + $0x38] sm:$0xff] }
   0x4   :  { %v55_v9 = vpack.c.bf16 %v26_v7, %v25_v6  ;;  %v29_v12 = vld [vmem:[%s1510_s0 + $0x40] sm:$0xff]  ;;  %v30_v13 = vld [vmem:[%s1510_s0 + $0x48] sm:$0xff]  ;;  %v56_v14 = vpack.c.bf16 %v28_v11, %v27_v10  ;;  %v31_v17 = vld [vmem:[%s1510_s0 + $0x50] sm:$0xff] }
   0x5   :  { %905 = vmatprep.mubr.msk.bf16.mxu0 %vm84_vm0, %v53_v4  ;;  %v57_v15 = vpack.c.bf16 %v30_v13, %v29_v12  ;;  %v1002_v16 = vld [vmem:[%s1511_s3] sm:$0xff]   ;;  %v32_v18 = vld [vmem:[%s1510_s0 + $0x58] sm:$0xff]  ;;  %v1003_v19 = vld [vmem:[%s1511_s3 + $0x8] sm:$0xff]  }
   0x6   :  { %906 = vmatmul.mubr.msk.bf16.vlgmr.msra.gmra.mrb[0].mxu0 %vm84_vm0, %v54_v8  ;;  %v33_v20 = vld [vmem:[%s1510_s0 + $0x60] sm:$0xff]  ;;  %v34_v21 = vld [vmem:[%s1510_s0 + $0x68] sm:$0xff]  ;;  %937 = vmatprep.subr.bf16.mxu0 %v1002_v16  ;;  %v58_v22 = vpack.c.bf16 %v32_v18, %v31_v17  ;;  %v35_v24 = vld [vmem:[%s1510_s0 + $0x70] sm:$0xff] }
   0x7   :  { %909 = vmatprep.mubr.msk.bf16.mxu0 %vm84_vm0, %v55_v9  ;;  %938 = vmatpush3.bf16.msra.mxu0 %v1002_v16  ;;  %v59_v23 = vpack.c.bf16 %v34_v21, %v33_v20  ;;  %v36_v25 = vld [vmem:[%s1510_s0 + $0x78] sm:$0xff]  ;;  %v37_v26 = vld [vmem:[%s1510_s0 + $0x80] sm:$0xff]  ;;  %v38_v27 = vld [vmem:[%s1510_s0 + $0x88] sm:$0xff] }
   0x8   :  { %939 = vmatprep.subr.bf16.mxu0 %v1003_v19  ;;  %985 = vmatprep.subr.bf16.mxu1 %v1002_v16  ;;  %v60_v28 = vpack.c.bf16 %v36_v25, %v35_v24  ;;  %v61_v29 = vpack.c.bf16 %v38_v27, %v37_v26  ;;  %v39_v30 = vld [vmem:[%s1510_s0 + $0x90] sm:$0xff]  ;;  %v40_v31 = vld [vmem:[%s1510_s0 + $0x98] sm:$0xff]  ;;  %v41_v32 = vld [vmem:[%s1510_s0 + $0xa0] sm:$0xff] }
   0x9   :  { %993 = vmatpush3.bf16.msra.mxu1 %v1002_v16  ;;  %v42_v33 = vld [vmem:[%s1510_s0 + $0xa8] sm:$0xff]  ;;  %v62_v34 = vpack.c.bf16 %v40_v31, %v39_v30  ;;  %v43_v36 = vld [vmem:[%s1510_s0 + $0xb0] sm:$0xff]  ;;  %v44_v37 = vld [vmem:[%s1510_s0 + $0xb8] sm:$0xff] }
   0xa   :  { %986 = vmatprep.subr.bf16.mxu1 %v1003_v19  ;;  %v63_v35 = vpack.c.bf16 %v42_v33, %v41_v32  ;;  %v45_v38 = vld [vmem:[%s1510_s0 + $0xc0] sm:$0xff]  ;;  %v46_v39 = vld [vmem:[%s1510_s0 + $0xc8] sm:$0xff]  ;;  %v64_v40 = vpack.c.bf16 %v44_v37, %v43_v36  ;;  %v47_v42 = vld [vmem:[%s1510_s0 + $0xd0] sm:$0xff] }
   0xb   :  { %940 = vmatpush3.bf16.msra.mxu0 %v1003_v19  ;;  %v65_v41 = vpack.c.bf16 %v46_v39, %v45_v38  ;;  %v48_v43 = vld [vmem:[%s1510_s0 + $0xd8] sm:$0xff]  ;;  %v49_v44 = vld [vmem:[%s1510_s0 + $0xe0] sm:$0xff]  ;;  %v50_v45 = vld [vmem:[%s1510_s0 + $0xe8] sm:$0xff] }
   0xc   :  { %v66_v46 = vpack.c.bf16 %v48_v43, %v47_v42  ;;  %v67_v47 = vpack.c.bf16 %v50_v45, %v49_v44  ;;  %v51_v48 = vld [vmem:[%s1510_s0 + $0xf0] sm:$0xff]  ;;  %v52_v49 = vld [vmem:[%s1510_s0 + $0xf8] sm:$0xff]  ;;  %v1006_v53 = vld [vmem:[%s1511_s3 + $0x20] sm:$0xff]  }
   0xd   :  { %994 = vmatpush3.bf16.msra.mxu1 %v1003_v19  ;;  %v68_v50 = vpack.c.bf16 %v52_v49, %v51_v48  ;;  %v1004_v51 = vld [vmem:[%s1511_s3 + $0x10] sm:$0xff]   ;;  %v1005_v52 = vld [vmem:[%s1511_s3 + $0x18] sm:$0xff]   ;;  %v1007_v54 = vld [vmem:[%s1511_s3 + $0x28] sm:$0xff]  }
   0xe   :  { %910 = vmatmul.mubr.msk.bf16.gmra.mrb[4].mxu0 %vm84_vm0, %v56_v14  ;;  %941 = vmatprep.subr.bf16.mxu0 %v1004_v51  ;;  %v1008_v55 = vld [vmem:[%s1511_s3 + $0x30] sm:$0xff]   ;;  %v1009_v56 = vld [vmem:[%s1511_s3 + $0x38] sm:$0xff]   ;;  %v1310_v57 = vld [vmem:[%s1512_s2] ss:$0 sm:$0xff] }
   0xf   :  { %913 = vmatprep.mubr.msk.bf16.mxu0 %vm84_vm0, %v57_v15  ;;  %987 = vmatprep.subr.bf16.mxu1 %v1004_v51 }
  0x10   :  { %942 = vmatpush3.bf16.msra.mxu0 %v1004_v51 }
  0x11   :  { %995 = vmatpush3.bf16.msra.mxu1 %v1004_v51  ;;  %943 = vmatprep.subr.bf16.mxu0 %v1005_v52 }
  0x12   :  { %988 = vmatprep.subr.bf16.mxu1 %v1005_v52 }
  0x14   :  { %944 = vmatpush3.bf16.msra.mxu0 %v1005_v52 }
  0x15   :  { %996 = vmatpush3.bf16.msra.mxu1 %v1005_v52  ;;  %945 = vmatprep.subr.bf16.mxu0 %v1006_v53 }
  0x16   :  { %914 = vmatmul.mubr.msk.bf16.gmra.mrb[8].mxu0 %vm84_vm0, %v58_v22  ;;  %989 = vmatprep.subr.bf16.mxu1 %v1006_v53 }
  0x17   :  { %917 = vmatprep.mubr.msk.bf16.mxu0 %vm84_vm0, %v59_v23 }
  0x18   :  { %946 = vmatpush3.bf16.msra.mxu0 %v1006_v53 }
  0x19   :  { %997 = vmatpush3.bf16.msra.mxu1 %v1006_v53  ;;  %947 = vmatprep.subr.bf16.mxu0 %v1007_v54 }
  0x1a   :  { %990 = vmatprep.subr.bf16.mxu1 %v1007_v54 }
  0x1c   :  { %948 = vmatpush3.bf16.msra.mxu0 %v1007_v54 }
  0x1d   :  { %998 = vmatpush3.bf16.msra.mxu1 %v1007_v54  ;;  %949 = vmatprep.subr.bf16.mxu0 %v1008_v55 }
  0x1e   :  { %918 = vmatmul.mubr.msk.bf16.gmra.mrb[12].mxu0 %vm84_vm0, %v60_v28  ;;  %991 = vmatprep.subr.bf16.mxu1 %v1008_v55 }
  0x1f   :  { %921 = vmatprep.mubr.msk.bf16.mxu0 %vm84_vm0, %v61_v29 }
  0x20   :  { %950 = vmatpush3.bf16.msra.mxu0 %v1008_v55 }
  0x21   :  { %999 = vmatpush3.bf16.msra.mxu1 %v1008_v55  ;;  %951 = vmatprep.subr.bf16.mxu0 %v1009_v56 }
  0x22   :  { %992 = vmatprep.subr.bf16.mxu1 %v1009_v56 }
  0x24   :  { %952 = vmatpush3.bf16.msra.mxu0 %v1009_v56 }
  0x25   :  { %1000 = vmatpush3.bf16.msra.mxu1 %v1009_v56 }
  0x26   :  { %922 = vmatmul.mubr.msk.bf16.gmra.mrb[16].mxu0 %vm84_vm0, %v62_v34 }
  0x27   :  { %925 = vmatprep.mubr.msk.bf16.mxu0 %vm84_vm0, %v63_v35 }
  0x2e   :  { %926 = vmatmul.mubr.msk.bf16.gmra.mrb[20].mxu0 %vm84_vm0, %v64_v40 }
  0x2f   :  { %929 = vmatprep.mubr.msk.bf16.mxu0 %vm84_vm0, %v65_v41 }
  0x36   :  { %930 = vmatmul.mubr.msk.bf16.gmra.mrb[24].mxu0 %vm84_vm0, %v66_v46 }
  0x37   :  { %933 = vmatprep.mubr.msk.bf16.mxu0 %vm84_vm0, %v67_v47 }
  0x3e   :  { %934 = vmatmul.mubr.msk.bf16.gmra.mrb[28].mxu0 %vm84_vm0, %v68_v50 }
  0xd9   :  { %v907_v58 = vpop.f32.mrb[0].mxu0 }
  0xda   :  { %v176_v59 = vadd.f32 %v907_v58, %v1310_v57  ;;  %v167_v60 = vpop.f32.mrb[1].mxu0 }
  0xdb   :  { %v168_v61 = vadd.f32 %v1310_v57, %v167_v60  ;;  %v908_v62 = vpop.f32.mrb[2].mxu0 }
  0xdc   :  { %v296_v63 = vmul.f32 0.5, %v176_v59  ;;  %v179_v0 = vadd.f32 %v908_v62, %v1310_v57  ;;  %v170_v1 = vpop.f32.mrb[3].mxu0 }
  0xdd   :  { %v294_v2 = vmul.f32 0.5, %v168_v61  ;;  %v171_v3 = vadd.f32 %v1310_v57, %v170_v1 }
  0xde   :  { %1010 = vtanh.f32 %v296_v63  ;;  %v297_v4 = vmul.f32 0.5, %v179_v0 }
  0xdf   :  { %1012 = vtanh.f32 %v294_v2  ;;  %v295_v5 = vmul.f32 0.5, %v171_v3 }
  0xe0   :  { %1014 = vtanh.f32 %v297_v4 }
  0xe1   :  { %1016 = vtanh.f32 %v295_v5  ;;  %v911_v6 = vpop.f32.mrb[4].mxu0 }
  0xe2   :  { %v192_v7 = vadd.f32 %v911_v6, %v1310_v57  ;;  %v183_v8 = vpop.f32.mrb[5].mxu0 }
  0xe3   :  { %v184_v9 = vadd.f32 %v1310_v57, %v183_v8  ;;  %v912_v10 = vpop.f32.mrb[6].mxu0 }
  0xe4   :  { %v300_v11 = vmul.f32 0.5, %v192_v7  ;;  %v195_v12 = vadd.f32 %v912_v10, %v1310_v57  ;;  %v186_v13 = vpop.f32.mrb[7].mxu0 }
  0xe5   :  { %v298_v14 = vmul.f32 0.5, %v184_v9  ;;  %v187_v15 = vadd.f32 %v1310_v57, %v186_v13 }
  0xe6   :  { %1018 = vtanh.f32 %v300_v11  ;;  %v301_v16 = vmul.f32 0.5, %v195_v12 }
  0xe7   :  { %1020 = vtanh.f32 %v298_v14  ;;  %v299_v17 = vmul.f32 0.5, %v187_v15 }
  0xe8   :  { %v1011_v18 = vpop.eup %1010  ;;  %1022 = vtanh.f32 %v301_v16 }
  0xe9   :  { %v1013_v19 = vpop.eup %1012  ;;  %v360_v20 = vmul.f32 0.5, %v1011_v18  ;;  %1024 = vtanh.f32 %v299_v17  ;;  %v915_v21 = vpop.f32.mrb[8].mxu0 }
  0xea   :  { %v1015_v22 = vpop.eup %1014  ;;  %v358_v23 = vmul.f32 0.5, %v1013_v19  ;;  %v208_v24 = vadd.f32 %v915_v21, %v1310_v57  ;;  %v199_v25 = vpop.f32.mrb[9].mxu0 }
  0xeb   :  { %v1017_v26 = vpop.eup %1016  ;;  %v361_v27 = vmul.f32 0.5, %v1015_v22  ;;  %v200_v28 = vadd.f32 %v1310_v57, %v199_v25  ;;  %v916_v29 = vpop.f32.mrb[10].mxu0  ;;  %v392_v34 = vadd.f32 0.5, %v360_v20 }
  0xec   :  { %v359_v30 = vmul.f32 0.5, %v1017_v26  ;;  %v304_v31 = vmul.f32 0.5, %v208_v24  ;;  %v211_v32 = vadd.f32 %v916_v29, %v1310_v57  ;;  %v202_v33 = vpop.f32.mrb[11].mxu0  ;;  %v390_v38 = vadd.f32 0.5, %v358_v23 }
  0xed   :  { %v393_v35 = vadd.f32 0.5, %v361_v27  ;;  %v302_v36 = vmul.f32 0.5, %v200_v28  ;;  %v203_v37 = vadd.f32 %v1310_v57, %v202_v33 }
  0xee   :  { %v391_v39 = vadd.f32 0.5, %v359_v30  ;;  %1026 = vtanh.f32 %v304_v31  ;;  %v305_v40 = vmul.f32 0.5, %v211_v32 }
  0xef   :  { %v423_v41 = vpack.c.bf16 %v393_v35, %v392_v34  ;;  %1028 = vtanh.f32 %v302_v36  ;;  %v303_v42 = vmul.f32 0.5, %v203_v37 }
  0xf0   :  { %v1019_v43 = vpop.eup %1018  ;;  %1030 = vtanh.f32 %v305_v40  ;;  %v422_v44 = vpack.c.bf16 %v391_v39, %v390_v38 }
  0xf1   :  { %v1021_v45 = vpop.eup %1020  ;;  %v364_v46 = vmul.f32 0.5, %v1019_v43  ;;  %1032 = vtanh.f32 %v303_v42  ;;  %v919_v47 = vpop.f32.mrb[12].mxu0 }
  0xf2   :  { %v1023_v48 = vpop.eup %1022  ;;  %v224_v49 = vadd.f32 %v919_v47, %v1310_v57  ;;  %v215_v50 = vpop.f32.mrb[13].mxu0  ;;  %953 = vmatprep.mubr.bf16.mxu0 %v422_v44  ;;  %v362_v51 = vmul.f32 0.5, %v1021_v45 }
  0xf3   :  { %v1025_v52 = vpop.eup %1024  ;;  %v365_v53 = vmul.f32 0.5, %v1023_v48  ;;  %v216_v54 = vadd.f32 %v1310_v57, %v215_v50  ;;  %v920_v55 = vpop.f32.mrb[14].mxu0  ;;  %954 = vmatmul.mubr.bf16.vlgmr.msra.gmra.mrb[32].mxu0 %v423_v41  ;;  %v396_v61 = vadd.f32 0.5, %v364_v46 }
  0xf4   :  { %v308_v56 = vmul.f32 0.5, %v224_v49  ;;  %v227_v58 = vadd.f32 %v920_v55, %v1310_v57  ;;  %v218_v59 = vpop.f32.mrb[15].mxu0  ;;  %v363_v60 = vmul.f32 0.5, %v1025_v52  ;;  %v394_v2 = vadd.f32 0.5, %v362_v51 }
  0xf5   :  { %v397_v62 = vadd.f32 0.5, %v365_v53  ;;  %v306_v63 = vmul.f32 0.5, %v216_v54  ;;  %v219_v0 = vadd.f32 %v1310_v57, %v218_v59 }
  0xf6   :  { %1034 = vtanh.f32 %v308_v56  ;;  %v309_v1 = vmul.f32 0.5, %v227_v58  ;;  %v395_v3 = vadd.f32 0.5, %v363_v60 }
  0xf7   :  { %1036 = vtanh.f32 %v306_v63  ;;  %v307_v4 = vmul.f32 0.5, %v219_v0  ;;  %v425_v5 = vpack.c.bf16 %v397_v62, %v396_v61 }
  0xf8   :  { %v1027_v6 = vpop.eup %1026  ;;  %1038 = vtanh.f32 %v309_v1  ;;  %v424_v7 = vpack.c.bf16 %v395_v3, %v394_v2 }
  0xf9   :  { %v1029_v8 = vpop.eup %1028  ;;  %v368_v9 = vmul.f32 0.5, %v1027_v6  ;;  %1040 = vtanh.f32 %v307_v4  ;;  %v923_v10 = vpop.f32.mrb[16].mxu0 }
  0xfa   :  { %v1031_v11 = vpop.eup %1030  ;;  %v366_v12 = vmul.f32 0.5, %v1029_v8  ;;  %v240_v13 = vadd.f32 %v923_v10, %v1310_v57  ;;  %v231_v14 = vpop.f32.mrb[17].mxu0  ;;  %957 = vmatprep.mubr.bf16.mxu1 %v424_v7 }
  0xfb   :  { %v1033_v15 = vpop.eup %1032  ;;  %v369_v16 = vmul.f32 0.5, %v1031_v11  ;;  %v232_v17 = vadd.f32 %v1310_v57, %v231_v14  ;;  %v924_v18 = vpop.f32.mrb[18].mxu0  ;;  %958 = vmatmul.mubr.bf16.vlgmr.msra.gmra.mrb[0].mxu1 %v425_v5  ;;  %v400_v23 = vadd.f32 0.5, %v368_v9 }
  0xfc   :  { %v367_v19 = vmul.f32 0.5, %v1033_v15  ;;  %v312_v20 = vmul.f32 0.5, %v240_v13  ;;  %v243_v21 = vadd.f32 %v924_v18, %v1310_v57  ;;  %v234_v22 = vpop.f32.mrb[19].mxu0  ;;  %v398_v27 = vadd.f32 0.5, %v366_v12 }
  0xfd   :  { %v401_v24 = vadd.f32 0.5, %v369_v16  ;;  %v310_v25 = vmul.f32 0.5, %v232_v17  ;;  %v235_v26 = vadd.f32 %v1310_v57, %v234_v22 }
  0xfe   :  { %v399_v28 = vadd.f32 0.5, %v367_v19  ;;  %1042 = vtanh.f32 %v312_v20  ;;  %v313_v29 = vmul.f32 0.5, %v243_v21 }
  0xff   :  { %1044 = vtanh.f32 %v310_v25  ;;  %v311_v30 = vmul.f32 0.5, %v235_v26  ;;  %v427_v31 = vpack.c.bf16 %v401_v24, %v400_v23 }
 0x100   :  { %v1035_v32 = vpop.eup %1034  ;;  %1046 = vtanh.f32 %v313_v29  ;;  %v426_v33 = vpack.c.bf16 %v399_v28, %v398_v27 }
 0x101   :  { %v1037_v34 = vpop.eup %1036  ;;  %v372_v35 = vmul.f32 0.5, %v1035_v32  ;;  %1048 = vtanh.f32 %v311_v30  ;;  %v927_v36 = vpop.f32.mrb[20].mxu0 }
 0x102   :  { %v1039_v37 = vpop.eup %1038  ;;  %v370_v38 = vmul.f32 0.5, %v1037_v34  ;;  %v256_v39 = vadd.f32 %v927_v36, %v1310_v57  ;;  %v247_v40 = vpop.f32.mrb[21].mxu0  ;;  %961 = vmatprep.mubr.bf16.mxu1 %v426_v33 }
 0x103   :  { %v1041_v41 = vpop.eup %1040  ;;  %v373_v42 = vmul.f32 0.5, %v1039_v37  ;;  %v248_v43 = vadd.f32 %v1310_v57, %v247_v40  ;;  %v928_v44 = vpop.f32.mrb[22].mxu0  ;;  %962 = vmatmul.mubr.bf16.gmra.mrb[4].mxu1 %v427_v31  ;;  %v404_v49 = vadd.f32 0.5, %v372_v35 }
 0x104   :  { %v371_v45 = vmul.f32 0.5, %v1041_v41  ;;  %v316_v46 = vmul.f32 0.5, %v256_v39  ;;  %v259_v47 = vadd.f32 %v928_v44, %v1310_v57  ;;  %v250_v48 = vpop.f32.mrb[23].mxu0  ;;  %v402_v53 = vadd.f32 0.5, %v370_v38 }
 0x105   :  { %v405_v50 = vadd.f32 0.5, %v373_v42  ;;  %v314_v51 = vmul.f32 0.5, %v248_v43  ;;  %v251_v52 = vadd.f32 %v1310_v57, %v250_v48 }
 0x106   :  { %v403_v54 = vadd.f32 0.5, %v371_v45  ;;  %1050 = vtanh.f32 %v316_v46  ;;  %v317_v55 = vmul.f32 0.5, %v259_v47 }
 0x107   :  { %1052 = vtanh.f32 %v314_v51  ;;  %v315_v56 = vmul.f32 0.5, %v251_v52  ;;  %v429_v58 = vpack.c.bf16 %v405_v50, %v404_v49 }
 0x108   :  { %v1043_v59 = vpop.eup %1042  ;;  %1054 = vtanh.f32 %v317_v55  ;;  %v428_v60 = vpack.c.bf16 %v403_v54, %v402_v53 }
 0x109   :  { %v1045_v61 = vpop.eup %1044  ;;  %v376_v62 = vmul.f32 0.5, %v1043_v59  ;;  %1056 = vtanh.f32 %v315_v56  ;;  %v931_v63 = vpop.f32.mrb[24].mxu0 }
 0x10a   :  { %v1047_v0 = vpop.eup %1046  ;;  %v374_v1 = vmul.f32 0.5, %v1045_v61  ;;  %v272_v2 = vadd.f32 %v931_v63, %v1310_v57  ;;  %v263_v3 = vpop.f32.mrb[25].mxu0  ;;  %965 = vmatprep.mubr.bf16.mxu1 %v428_v60 }
 0x10b   :  { %v1049_v4 = vpop.eup %1048  ;;  %v377_v5 = vmul.f32 0.5, %v1047_v0  ;;  %v264_v6 = vadd.f32 %v1310_v57, %v263_v3  ;;  %v932_v7 = vpop.f32.mrb[26].mxu0  ;;  %966 = vmatmul.mubr.bf16.gmra.mrb[8].mxu1 %v429_v58  ;;  %v408_v12 = vadd.f32 0.5, %v376_v62 }
 0x10c   :  { %v375_v8 = vmul.f32 0.5, %v1049_v4  ;;  %v320_v9 = vmul.f32 0.5, %v272_v2  ;;  %v275_v10 = vadd.f32 %v932_v7, %v1310_v57  ;;  %v266_v11 = vpop.f32.mrb[27].mxu0  ;;  %v406_v16 = vadd.f32 0.5, %v374_v1 }
 0x10d   :  { %v409_v13 = vadd.f32 0.5, %v377_v5  ;;  %v318_v14 = vmul.f32 0.5, %v264_v6  ;;  %v267_v15 = vadd.f32 %v1310_v57, %v266_v11 }
 0x10e   :  { %v407_v17 = vadd.f32 0.5, %v375_v8  ;;  %1058 = vtanh.f32 %v320_v9  ;;  %v321_v18 = vmul.f32 0.5, %v275_v10 }
 0x10f   :  { %1060 = vtanh.f32 %v318_v14  ;;  %v319_v19 = vmul.f32 0.5, %v267_v15  ;;  %v431_v20 = vpack.c.bf16 %v409_v13, %v408_v12  ;;  %v1347_v12 = vld [vmem:[%s1513_s4] ss:$0 sm:$0xff] }
 0x110   :  { %v1051_v21 = vpop.eup %1050  ;;  %1062 = vtanh.f32 %v321_v18  ;;  %v430_v22 = vpack.c.bf16 %v407_v17, %v406_v16 }
 0x111   :  { %v1053_v23 = vpop.eup %1052  ;;  %v380_v24 = vmul.f32 0.5, %v1051_v21  ;;  %1064 = vtanh.f32 %v319_v19  ;;  %v935_v25 = vpop.f32.mrb[28].mxu0 }
 0x112   :  { %v1055_v26 = vpop.eup %1054  ;;  %v378_v27 = vmul.f32 0.5, %v1053_v23  ;;  %v288_v28 = vadd.f32 %v935_v25, %v1310_v57  ;;  %v279_v29 = vpop.f32.mrb[29].mxu0  ;;  %969 = vmatprep.mubr.bf16.mxu1 %v430_v22 }
 0x113   :  { %v1057_v30 = vpop.eup %1056  ;;  %v381_v31 = vmul.f32 0.5, %v1055_v26  ;;  %v280_v32 = vadd.f32 %v1310_v57, %v279_v29  ;;  %v936_v33 = vpop.f32.mrb[30].mxu0  ;;  %970 = vmatmul.mubr.bf16.gmra.mrb[12].mxu1 %v431_v20  ;;  %v412_v38 = vadd.f32 0.5, %v380_v24 }
 0x114   :  { %v379_v34 = vmul.f32 0.5, %v1057_v30  ;;  %v324_v35 = vmul.f32 0.5, %v288_v28  ;;  %v291_v36 = vadd.f32 %v936_v33, %v1310_v57  ;;  %v282_v37 = vpop.f32.mrb[31].mxu0  ;;  %v410_v42 = vadd.f32 0.5, %v378_v27 }
 0x115   :  { %v413_v39 = vadd.f32 0.5, %v381_v31  ;;  %v322_v40 = vmul.f32 0.5, %v280_v32  ;;  %v283_v41 = vadd.f32 %v1310_v57, %v282_v37 }
 0x116   :  { %v411_v43 = vadd.f32 0.5, %v379_v34  ;;  %1066 = vtanh.f32 %v324_v35  ;;  %v325_v44 = vmul.f32 0.5, %v291_v36 }
 0x117   :  { %1068 = vtanh.f32 %v322_v40  ;;  %v323_v45 = vmul.f32 0.5, %v283_v41  ;;  %v433_v46 = vpack.c.bf16 %v413_v39, %v412_v38 }
 0x118   :  { %v1059_v47 = vpop.eup %1058  ;;  %1070 = vtanh.f32 %v325_v44  ;;  %v432_v48 = vpack.c.bf16 %v411_v43, %v410_v42 }
 0x119   :  { %v1061_v49 = vpop.eup %1060  ;;  %v384_v50 = vmul.f32 0.5, %v1059_v47  ;;  %1072 = vtanh.f32 %v323_v45 }
 0x11a   :  { %v1063_v51 = vpop.eup %1062  ;;  %v382_v52 = vmul.f32 0.5, %v1061_v49  ;;  %973 = vmatprep.mubr.bf16.mxu1 %v432_v48 }
 0x11b   :  { %v1065_v53 = vpop.eup %1064  ;;  %v385_v54 = vmul.f32 0.5, %v1063_v51  ;;  %974 = vmatmul.mubr.bf16.gmra.mrb[16].mxu1 %v433_v46  ;;  %v416_v55 = vadd.f32 0.5, %v384_v50 }
 0x11c   :  { %v383_v57 = vmul.f32 0.5, %v1065_v53  ;;  %v414_v58 = vadd.f32 0.5, %v382_v52 }
 0x11d   :  { %v417_v56 = vadd.f32 0.5, %v385_v54 }
 0x11e   :  { %v415_v59 = vadd.f32 0.5, %v383_v57 }
 0x11f   :  { %v435_v60 = vpack.c.bf16 %v417_v56, %v416_v55 }
 0x120   :  { %v1067_v61 = vpop.eup %1066  ;;  %v434_v62 = vpack.c.bf16 %v415_v59, %v414_v58 }
 0x121   :  { %v1069_v63 = vpop.eup %1068  ;;  %v388_v0 = vmul.f32 0.5, %v1067_v61 }
 0x122   :  { %v1071_v1 = vpop.eup %1070  ;;  %v386_v2 = vmul.f32 0.5, %v1069_v63  ;;  %977 = vmatprep.mubr.bf16.mxu1 %v434_v62 }
 0x123   :  { %v1073_v3 = vpop.eup %1072  ;;  %v389_v4 = vmul.f32 0.5, %v1071_v1  ;;  %978 = vmatmul.mubr.bf16.gmra.mrb[20].mxu1 %v435_v60  ;;  %v420_v6 = vadd.f32 0.5, %v388_v0 }
 0x124   :  { %v387_v5 = vmul.f32 0.5, %v1073_v3  ;;  %v418_v8 = vadd.f32 0.5, %v386_v2 }
 0x125   :  { %v421_v7 = vadd.f32 0.5, %v389_v4 }
 0x126   :  { %v419_v9 = vadd.f32 0.5, %v387_v5 }
 0x127   :  { %v437_v10 = vpack.c.bf16 %v421_v7, %v420_v6 }
 0x128   :  { %v436_v11 = vpack.c.bf16 %v419_v9, %v418_v8 }
 0x12a   :  { %981 = vmatprep.mubr.bf16.mxu1 %v436_v11 }
 0x12b   :  { %982 = vmatmul.mubr.bf16.gmra.mrb[24].mxu1 %v437_v10 }
 0x1c6   :  { %v955_v13 = vpop.f32.mrb[32].mxu0 }
 0x1c7   :  { %v552_v14 = vadd.f32 %v955_v13, %v1347_v12  ;;  %v543_v15 = vpop.f32.mrb[33].mxu0 }
 0x1c8   :  { %v544_v16 = vadd.f32 %v1347_v12, %v543_v15  ;;  %v956_v17 = vpop.f32.mrb[34].mxu0 }
 0x1c9   :  { %v672_v18 = vmul.f32 0.5, %v552_v14  ;;  %v555_v19 = vadd.f32 %v956_v17, %v1347_v12  ;;  %v546_v20 = vpop.f32.mrb[35].mxu0 }
 0x1ca   :  { %v670_v21 = vmul.f32 0.5, %v544_v16  ;;  %v547_v22 = vadd.f32 %v1347_v12, %v546_v20 }
 0x1cb   :  { %1074 = vtanh.f32 %v672_v18  ;;  %v673_v23 = vmul.f32 0.5, %v555_v19 }
 0x1cc   :  { %1076 = vtanh.f32 %v670_v21  ;;  %v671_v24 = vmul.f32 0.5, %v547_v22 }
 0x1cd   :  { %1078 = vtanh.f32 %v673_v23 }
 0x1ce   :  { %1080 = vtanh.f32 %v671_v24  ;;  %v959_v25 = vpop.f32.mrb[0].mxu1 }
 0x1cf   :  { %v568_v26 = vadd.f32 %v959_v25, %v1347_v12  ;;  %v559_v27 = vpop.f32.mrb[1].mxu1 }
 0x1d0   :  { %v560_v28 = vadd.f32 %v1347_v12, %v559_v27  ;;  %v960_v29 = vpop.f32.mrb[2].mxu1 }
 0x1d1   :  { %v676_v30 = vmul.f32 0.5, %v568_v26  ;;  %v571_v31 = vadd.f32 %v960_v29, %v1347_v12  ;;  %v562_v32 = vpop.f32.mrb[3].mxu1 }
 0x1d2   :  { %v674_v33 = vmul.f32 0.5, %v560_v28  ;;  %v563_v34 = vadd.f32 %v1347_v12, %v562_v32 }
 0x1d3   :  { %1082 = vtanh.f32 %v676_v30  ;;  %v677_v35 = vmul.f32 0.5, %v571_v31 }
 0x1d4   :  { %1084 = vtanh.f32 %v674_v33  ;;  %v675_v36 = vmul.f32 0.5, %v563_v34 }
 0x1d5   :  { %v1075_v37 = vpop.eup %1074  ;;  %1086 = vtanh.f32 %v677_v35 }
 0x1d6   :  { %v1077_v38 = vpop.eup %1076  ;;  %v736_v39 = vmul.f32 0.5, %v1075_v37  ;;  %1088 = vtanh.f32 %v675_v36  ;;  %v963_v40 = vpop.f32.mrb[4].mxu1 }
 0x1d7   :  { %v1079_v41 = vpop.eup %1078  ;;  %v734_v42 = vmul.f32 0.5, %v1077_v38  ;;  %v584_v43 = vadd.f32 %v963_v40, %v1347_v12  ;;  %v575_v44 = vpop.f32.mrb[5].mxu1 }
 0x1d8   :  { %v1081_v45 = vpop.eup %1080  ;;  %v768_v46 = vadd.f32 0.5, %v736_v39  ;;  %v737_v47 = vmul.f32 0.5, %v1079_v41  ;;  %v576_v48 = vadd.f32 %v1347_v12, %v575_v44  ;;  %v964_v49 = vpop.f32.mrb[6].mxu1 }
 0x1d9   :  { %v766_v50 = vadd.f32 0.5, %v734_v42  ;;  %v735_v51 = vmul.f32 0.5, %v1081_v45  ;;  %v680_v52 = vmul.f32 0.5, %v584_v43  ;;  %v587_v53 = vadd.f32 %v964_v49, %v1347_v12  ;;  %v578_v54 = vpop.f32.mrb[7].mxu1 }
 0x1da   :  { %801 = vst.msk [vmem:[%s1514_s5 + $0x10] sm:$0xff] %vm798_vm1, %v768_v46  ;;  %v769_v57 = vadd.f32 0.5, %v737_v47  ;;  %v678_v55 = vmul.f32 0.5, %v576_v48  ;;  %v579_v56 = vadd.f32 %v1347_v12, %v578_v54 }
 0x1db   :  { %799 = vst.msk [vmem:[%s1514_s5] sm:$0xff] %vm798_vm1, %v766_v50  ;;  %v767_v58 = vadd.f32 0.5, %v735_v51  ;;  %1090 = vtanh.f32 %v680_v52  ;;  %v681_v59 = vmul.f32 0.5, %v587_v53 }
 0x1dc   :  { %802 = vst.msk [vmem:[%s1514_s5 + $0x18] sm:$0xff] %vm798_vm1, %v769_v57  ;;  %1092 = vtanh.f32 %v678_v55  ;;  %v679_v60 = vmul.f32 0.5, %v579_v56 }
 0x1dd   :  { %v1083_v61 = vpop.eup %1082  ;;  %800 = vst.msk [vmem:[%s1514_s5 + $0x8] sm:$0xff] %vm798_vm1, %v767_v58  ;;  %1094 = vtanh.f32 %v681_v59 }
 0x1de   :  { %v1085_v62 = vpop.eup %1084  ;;  %v740_v63 = vmul.f32 0.5, %v1083_v61  ;;  %1096 = vtanh.f32 %v679_v60  ;;  %v967_v0 = vpop.f32.mrb[8].mxu1 }
 0x1df   :  { %v1087_v1 = vpop.eup %1086  ;;  %v738_v2 = vmul.f32 0.5, %v1085_v62  ;;  %v600_v3 = vadd.f32 %v967_v0, %v1347_v12  ;;  %v591_v4 = vpop.f32.mrb[9].mxu1 }
 0x1e0   :  { %v1089_v5 = vpop.eup %1088  ;;  %v772_v6 = vadd.f32 0.5, %v740_v63  ;;  %v741_v7 = vmul.f32 0.5, %v1087_v1  ;;  %v592_v8 = vadd.f32 %v1347_v12, %v591_v4  ;;  %v968_v9 = vpop.f32.mrb[10].mxu1 }
 0x1e1   :  { %v770_v10 = vadd.f32 0.5, %v738_v2  ;;  %v739_v11 = vmul.f32 0.5, %v1089_v5  ;;  %v684_v13 = vmul.f32 0.5, %v600_v3  ;;  %v603_v14 = vadd.f32 %v968_v9, %v1347_v12  ;;  %v594_v15 = vpop.f32.mrb[11].mxu1 }
 0x1e2   :  { %805 = vst.msk [vmem:[%s1514_s5 + $0x30] sm:$0xff] %vm798_vm1, %v772_v6  ;;  %v773_v16 = vadd.f32 0.5, %v741_v7  ;;  %v682_v17 = vmul.f32 0.5, %v592_v8  ;;  %v595_v18 = vadd.f32 %v1347_v12, %v594_v15 }
 0x1e3   :  { %803 = vst.msk [vmem:[%s1514_s5 + $0x20] sm:$0xff] %vm798_vm1, %v770_v10  ;;  %v771_v19 = vadd.f32 0.5, %v739_v11  ;;  %1098 = vtanh.f32 %v684_v13  ;;  %v685_v20 = vmul.f32 0.5, %v603_v14 }
 0x1e4   :  { %806 = vst.msk [vmem:[%s1514_s5 + $0x38] sm:$0xff] %vm798_vm1, %v773_v16  ;;  %1100 = vtanh.f32 %v682_v17  ;;  %v683_v21 = vmul.f32 0.5, %v595_v18 }
 0x1e5   :  { %v1091_v22 = vpop.eup %1090  ;;  %804 = vst.msk [vmem:[%s1514_s5 + $0x28] sm:$0xff] %vm798_vm1, %v771_v19  ;;  %1102 = vtanh.f32 %v685_v20 }
 0x1e6   :  { %v1093_v23 = vpop.eup %1092  ;;  %v744_v24 = vmul.f32 0.5, %v1091_v22  ;;  %1104 = vtanh.f32 %v683_v21  ;;  %v971_v25 = vpop.f32.mrb[12].mxu1 }
 0x1e7   :  { %v1095_v26 = vpop.eup %1094  ;;  %v742_v27 = vmul.f32 0.5, %v1093_v23  ;;  %v616_v28 = vadd.f32 %v971_v25, %v1347_v12  ;;  %v607_v29 = vpop.f32.mrb[13].mxu1 }
 0x1e8   :  { %v1097_v30 = vpop.eup %1096  ;;  %v776_v31 = vadd.f32 0.5, %v744_v24  ;;  %v745_v32 = vmul.f32 0.5, %v1095_v26  ;;  %v608_v33 = vadd.f32 %v1347_v12, %v607_v29  ;;  %v972_v34 = vpop.f32.mrb[14].mxu1 }
 0x1e9   :  { %v774_v35 = vadd.f32 0.5, %v742_v27  ;;  %v743_v36 = vmul.f32 0.5, %v1097_v30  ;;  %v688_v37 = vmul.f32 0.5, %v616_v28  ;;  %v619_v38 = vadd.f32 %v972_v34, %v1347_v12  ;;  %v610_v39 = vpop.f32.mrb[15].mxu1 }
 0x1ea   :  { %809 = vst.msk [vmem:[%s1514_s5 + $0x50] sm:$0xff] %vm798_vm1, %v776_v31  ;;  %v777_v40 = vadd.f32 0.5, %v745_v32  ;;  %v686_v41 = vmul.f32 0.5, %v608_v33  ;;  %v611_v42 = vadd.f32 %v1347_v12, %v610_v39 }
 0x1eb   :  { %807 = vst.msk [vmem:[%s1514_s5 + $0x40] sm:$0xff] %vm798_vm1, %v774_v35  ;;  %v775_v43 = vadd.f32 0.5, %v743_v36  ;;  %1106 = vtanh.f32 %v688_v37  ;;  %v689_v44 = vmul.f32 0.5, %v619_v38 }
 0x1ec   :  { %810 = vst.msk [vmem:[%s1514_s5 + $0x58] sm:$0xff] %vm798_vm1, %v777_v40  ;;  %1108 = vtanh.f32 %v686_v41  ;;  %v687_v45 = vmul.f32 0.5, %v611_v42 }
 0x1ed   :  { %v1099_v46 = vpop.eup %1098  ;;  %808 = vst.msk [vmem:[%s1514_s5 + $0x48] sm:$0xff] %vm798_vm1, %v775_v43  ;;  %1110 = vtanh.f32 %v689_v44 }
 0x1ee   :  { %v1101_v47 = vpop.eup %1100  ;;  %v748_v48 = vmul.f32 0.5, %v1099_v46  ;;  %1112 = vtanh.f32 %v687_v45  ;;  %v975_v49 = vpop.f32.mrb[16].mxu1 }
 0x1ef   :  { %v1103_v50 = vpop.eup %1102  ;;  %v746_v51 = vmul.f32 0.5, %v1101_v47  ;;  %v632_v52 = vadd.f32 %v975_v49, %v1347_v12  ;;  %v623_v53 = vpop.f32.mrb[17].mxu1 }
 0x1f0   :  { %v1105_v54 = vpop.eup %1104  ;;  %v780_v57 = vadd.f32 0.5, %v748_v48  ;;  %v749_v55 = vmul.f32 0.5, %v1103_v50  ;;  %v624_v56 = vadd.f32 %v1347_v12, %v623_v53  ;;  %v976_v58 = vpop.f32.mrb[18].mxu1 }
 0x1f1   :  { %v778_v59 = vadd.f32 0.5, %v746_v51  ;;  %v747_v60 = vmul.f32 0.5, %v1105_v54  ;;  %v692_v61 = vmul.f32 0.5, %v632_v52  ;;  %v635_v62 = vadd.f32 %v976_v58, %v1347_v12  ;;  %v626_v63 = vpop.f32.mrb[19].mxu1 }
 0x1f2   :  { %813 = vst.msk [vmem:[%s1514_s5 + $0x70] sm:$0xff] %vm798_vm1, %v780_v57  ;;  %v781_v0 = vadd.f32 0.5, %v749_v55  ;;  %v690_v1 = vmul.f32 0.5, %v624_v56  ;;  %v627_v2 = vadd.f32 %v1347_v12, %v626_v63 }
 0x1f3   :  { %811 = vst.msk [vmem:[%s1514_s5 + $0x60] sm:$0xff] %vm798_vm1, %v778_v59  ;;  %v779_v3 = vadd.f32 0.5, %v747_v60  ;;  %1114 = vtanh.f32 %v692_v61  ;;  %v693_v4 = vmul.f32 0.5, %v635_v62 }
 0x1f4   :  { %814 = vst.msk [vmem:[%s1514_s5 + $0x78] sm:$0xff] %vm798_vm1, %v781_v0  ;;  %1116 = vtanh.f32 %v690_v1  ;;  %v691_v5 = vmul.f32 0.5, %v627_v2 }
 0x1f5   :  { %v1107_v6 = vpop.eup %1106  ;;  %812 = vst.msk [vmem:[%s1514_s5 + $0x68] sm:$0xff] %vm798_vm1, %v779_v3  ;;  %1118 = vtanh.f32 %v693_v4 }
 0x1f6   :  { %v1109_v7 = vpop.eup %1108  ;;  %v752_v8 = vmul.f32 0.5, %v1107_v6  ;;  %1120 = vtanh.f32 %v691_v5  ;;  %v979_v9 = vpop.f32.mrb[20].mxu1 }
 0x1f7   :  { %v1111_v10 = vpop.eup %1110  ;;  %v750_v11 = vmul.f32 0.5, %v1109_v7  ;;  %v648_v13 = vadd.f32 %v979_v9, %v1347_v12  ;;  %v639_v14 = vpop.f32.mrb[21].mxu1 }
 0x1f8   :  { %v1113_v15 = vpop.eup %1112  ;;  %v784_v16 = vadd.f32 0.5, %v752_v8  ;;  %v753_v17 = vmul.f32 0.5, %v1111_v10  ;;  %v640_v18 = vadd.f32 %v1347_v12, %v639_v14  ;;  %v980_v19 = vpop.f32.mrb[22].mxu1 }
 0x1f9   :  { %v782_v20 = vadd.f32 0.5, %v750_v11  ;;  %v751_v21 = vmul.f32 0.5, %v1113_v15  ;;  %v696_v22 = vmul.f32 0.5, %v648_v13  ;;  %v651_v23 = vadd.f32 %v980_v19, %v1347_v12  ;;  %v642_v24 = vpop.f32.mrb[23].mxu1 }
 0x1fa   :  { %817 = vst.msk [vmem:[%s1514_s5 + $0x90] sm:$0xff] %vm798_vm1, %v784_v16  ;;  %v785_v25 = vadd.f32 0.5, %v753_v17  ;;  %v694_v26 = vmul.f32 0.5, %v640_v18  ;;  %v643_v27 = vadd.f32 %v1347_v12, %v642_v24 }
 0x1fb   :  { %815 = vst.msk [vmem:[%s1514_s5 + $0x80] sm:$0xff] %vm798_vm1, %v782_v20  ;;  %v783_v28 = vadd.f32 0.5, %v751_v21  ;;  %1122 = vtanh.f32 %v696_v22  ;;  %v697_v29 = vmul.f32 0.5, %v651_v23 }
 0x1fc   :  { %818 = vst.msk [vmem:[%s1514_s5 + $0x98] sm:$0xff] %vm798_vm1, %v785_v25  ;;  %1124 = vtanh.f32 %v694_v26  ;;  %v695_v30 = vmul.f32 0.5, %v643_v27 }
 0x1fd   :  { %v1115_v31 = vpop.eup %1114  ;;  %816 = vst.msk [vmem:[%s1514_s5 + $0x88] sm:$0xff] %vm798_vm1, %v783_v28  ;;  %1126 = vtanh.f32 %v697_v29 }
 0x1fe   :  { %v1117_v32 = vpop.eup %1116  ;;  %v756_v33 = vmul.f32 0.5, %v1115_v31  ;;  %1128 = vtanh.f32 %v695_v30  ;;  %v983_v34 = vpop.f32.mrb[24].mxu1 }
 0x1ff   :  { %v1119_v35 = vpop.eup %1118  ;;  %v754_v36 = vmul.f32 0.5, %v1117_v32  ;;  %v664_v37 = vadd.f32 %v983_v34, %v1347_v12  ;;  %v655_v38 = vpop.f32.mrb[25].mxu1 }
 0x200   :  { %v1121_v39 = vpop.eup %1120  ;;  %v788_v40 = vadd.f32 0.5, %v756_v33  ;;  %v757_v41 = vmul.f32 0.5, %v1119_v35  ;;  %v656_v42 = vadd.f32 %v1347_v12, %v655_v38  ;;  %v984_v43 = vpop.f32.mrb[26].mxu1 }
 0x201   :  { %v786_v44 = vadd.f32 0.5, %v754_v36  ;;  %v755_v45 = vmul.f32 0.5, %v1121_v39  ;;  %v700_v46 = vmul.f32 0.5, %v664_v37  ;;  %v667_v47 = vadd.f32 %v984_v43, %v1347_v12  ;;  %v658_v48 = vpop.f32.mrb[27].mxu1 }
 0x202   :  { %821 = vst.msk [vmem:[%s1514_s5 + $0xb0] sm:$0xff] %vm798_vm1, %v788_v40  ;;  %v789_v49 = vadd.f32 0.5, %v757_v41  ;;  %v698_v50 = vmul.f32 0.5, %v656_v42  ;;  %v659_v51 = vadd.f32 %v1347_v12, %v658_v48 }
 0x203   :  { %819 = vst.msk [vmem:[%s1514_s5 + $0xa0] sm:$0xff] %vm798_vm1, %v786_v44  ;;  %v787_v52 = vadd.f32 0.5, %v755_v45  ;;  %1130 = vtanh.f32 %v700_v46  ;;  %v701_v53 = vmul.f32 0.5, %v667_v47 }
 0x204   :  { %822 = vst.msk [vmem:[%s1514_s5 + $0xb8] sm:$0xff] %vm798_vm1, %v789_v49  ;;  %1132 = vtanh.f32 %v698_v50  ;;  %v699_v54 = vmul.f32 0.5, %v659_v51 }
 0x205   :  { %v1123_v57 = vpop.eup %1122  ;;  %820 = vst.msk [vmem:[%s1514_s5 + $0xa8] sm:$0xff] %vm798_vm1, %v787_v52  ;;  %1134 = vtanh.f32 %v701_v53 }
 0x206   :  { %v1125_v12 = vpop.eup %1124  ;;  %v760_v55 = vmul.f32 0.5, %v1123_v57  ;;  %1136 = vtanh.f32 %v699_v54 }
 0x207   :  { %v1127_v56 = vpop.eup %1126  ;;  %v758_v58 = vmul.f32 0.5, %v1125_v12 }
 0x208   :  { %v1129_v59 = vpop.eup %1128  ;;  %v792_v60 = vadd.f32 0.5, %v760_v55  ;;  %v761_v61 = vmul.f32 0.5, %v1127_v56 }
 0x209   :  { %v790_v62 = vadd.f32 0.5, %v758_v58  ;;  %v759_v63 = vmul.f32 0.5, %v1129_v59 }
 0x20a   :  { %825 = vst.msk [vmem:[%s1514_s5 + $0xd0] sm:$0xff] %vm798_vm1, %v792_v60  ;;  %v793_v0 = vadd.f32 0.5, %v761_v61 }
 0x20b   :  { %823 = vst.msk [vmem:[%s1514_s5 + $0xc0] sm:$0xff] %vm798_vm1, %v790_v62  ;;  %v791_v1 = vadd.f32 0.5, %v759_v63 }
 0x20c   :  { %826 = vst.msk [vmem:[%s1514_s5 + $0xd8] sm:$0xff] %vm798_vm1, %v793_v0 }
 0x20d   :  { %v1131_v2 = vpop.eup %1130  ;;  %824 = vst.msk [vmem:[%s1514_s5 + $0xc8] sm:$0xff] %vm798_vm1, %v791_v1 }
 0x20e   :  { %v1133_v3 = vpop.eup %1132  ;;  %v764_v4 = vmul.f32 0.5, %v1131_v2 }
 0x20f   :  { %v1135_v5 = vpop.eup %1134  ;;  %v762_v6 = vmul.f32 0.5, %v1133_v3 }
 0x210   :  { %v1137_v7 = vpop.eup %1136  ;;  %v796_v8 = vadd.f32 0.5, %v764_v4  ;;  %v765_v9 = vmul.f32 0.5, %v1135_v5 }
 0x211   :  { %v794_v10 = vadd.f32 0.5, %v762_v6  ;;  %v763_v11 = vmul.f32 0.5, %v1137_v7 }
 0x212   :  { %829 = vst.msk [vmem:[%s1514_s5 + $0xf0] sm:$0xff] %vm798_vm1, %v796_v8  ;;  %v797_v13 = vadd.f32 0.5, %v765_v9 }
 0x213   :  { %827 = vst.msk [vmem:[%s1514_s5 + $0xe0] sm:$0xff] %vm798_vm1, %v794_v10  ;;  %v795_v14 = vadd.f32 0.5, %v763_v11 }
 0x214   :  { %830 = vst.msk [vmem:[%s1514_s5 + $0xf8] sm:$0xff] %vm798_vm1, %v797_v13 }
 0x215   :  { %828 = vst.msk [vmem:[%s1514_s5 + $0xe8] sm:$0xff] %vm798_vm1, %v795_v14 }

</bundles_post_ra>
